<compile_context>
chip_gen: v5e
topology: v5e:2x2
jax: 0.10.0
libtpu: 0.0.40
codegen_flags: <defaults>
</compile_context>

<pallas_src>
import functools

import jax
import jax.numpy as jnp
import numpy as np
from jax import lax
from jax.experimental import pallas as pl
from jax.experimental.pallas import tpu as pltpu


# --------------------------------------------------------------------------- #
# Kernel
# --------------------------------------------------------------------------- #
def _ce_bound_smooth_kernel(lab_ref, logits_ref, out_ref, *, e, d, seq_len,
                            label_num, tile_s, bound_ids):
    """One grid step = (Bt sequences) x (Ts positions).

    lab_ref:    (Bt, Ts, 2d+1) int32; lab_ref[b, s, d+delta] = label id of
                global position s+delta of sequence b, or -1 if out of range.
    logits_ref: (Bt, Ts, L) in the caller's dtype.
    out_ref:    (1, Bt, 1, 128) f32 raw per-sequence partial sums.
    """
    S, L, D, E, Ts = seq_len, label_num, d, e, tile_s
    Bt = logits_ref.shape[0]
    s0 = pl.program_id(1) * Ts                 # global start of this seq tile

    # ---- full-(Bt,Ts,L) work: log-softmax ingredients + label gather --------
    x = logits_ref[...].astype(jnp.float32)                    # (Bt, Ts, L)
    m = jnp.max(x, axis=2, keepdims=True)                      # (Bt, Ts, 1)
    se = jnp.sum(jnp.exp(x - m), axis=2, keepdims=True)        # (Bt, Ts, 1)
    lse = m + jnp.log(se)                                      # logsumexp(x)

    lab = lab_ref[:, :, pl.ds(D, 1)]                           # (Bt, Ts, 1) labels
    lbl_row = lax.broadcasted_iota(jnp.int32, (1, 1, L), 2)
    x_lab = jnp.sum(jnp.where(lab == lbl_row, x, 0.0), axis=2, keepdims=True)

    # ---- per-(b,s) small work ------------------------------------------------
    is_bound = jnp.zeros(lab.shape, jnp.bool_)
    for bid in bound_ids:
        is_bound = jnp.logical_or(is_bound, lab == bid)
    # Non-bound labels keep their one-hot target: contribution = -logp[label].
    contrib = jnp.where(is_bound, 0.0, lse - x_lab)            # (Bt, Ts, 1)

    # Bound-label smoothing: per static bound id, ascending-writer
    # last-writer-wins sweep on (Bt, Ts, 1) data (reproduces the PyTorch
    # torch.nonzero write order: later writer positions overwrite earlier).
    if bound_ids:
        q = s0 + lax.broadcasted_iota(jnp.int32, (1, Ts, 1), 1)  # global pos
        vals = {bid: jnp.zeros((Bt, Ts, 1), jnp.float32) for bid in bound_ids}
        for delta in range(-D, D + 1):
            slab = lab_ref[:, :, pl.ds(D + delta, 1)]          # writer labels
            if delta == 0:
                val = jnp.float32(1.0 - E)
            else:
                dd = abs(delta)
                p = q + delta                                  # writer position
                cnt = ((p - dd) >= 0).astype(jnp.float32) + \
                      ((p + dd) <= (S - 1)).astype(jnp.float32)
                cnt = jnp.maximum(cnt, 1.0)
                # PyTorch divides by self.d (not the loop variable) -- preserved.
                val = jnp.float32(E) / (jnp.float32(D) * cnt)  # (1, Ts, 1)
            for bid in bound_ids:
                vals[bid] = jnp.where(slab == bid, val, vals[bid])
        for bid in bound_ids:
            # -logp at the static bound column: width-1 lane slice of the ref.
            x_bid = logits_ref[:, :, pl.ds(bid, 1)].astype(jnp.float32)
            contrib = contrib + vals[bid] * (lse - x_bid)

    # ---- per-sequence partial sums: sublane reduce only, lane-dense store ---
    seq_sum = jnp.sum(contrib, axis=1, keepdims=True)          # (Bt, 1, 1)
    out_ref[...] = jnp.broadcast_to(seq_sum[None], out_ref.shape)


# --------------------------------------------------------------------------- #
# Tiling / wrapper
# --------------------------------------------------------------------------- #
def _round_up(x, m):
    return (x + m - 1) // m * m


def _chip_vmem_bytes():
    try:
        cap = int(getattr(pltpu.get_tpu_info(), "vmem_capacity_bytes", 0))
        if cap > 0:
            return cap
    except Exception:
        pass
    return 64 * 1024 * 1024        # conservative (v7x per-core)


def _pick_tiles(batch_size, seq_len, label_num, itemsize, d, budget_bytes):
    """Largest (batch_tile, seq_tile) whose working set fits the VMEM budget.

    Working set per grid step: double-buffered logits block, double-buffered
    (128-lane-padded) shifted-label block, plus ~6 live full-size f32
    intermediates.  Tiles are restricted to divisors (no masking needed); the
    seq tile must be a multiple of 8 (sublane) or the full sequence length.
    """
    lane_l = _round_up(label_num, 128)
    lane_d = _round_up(2 * d + 1, 128)

    def footprint(bt, ts):
        ts_p = _round_up(ts, 8)
        logits_blk = bt * ts_p * lane_l * itemsize
        label_blk = bt * ts_p * lane_d * 4
        out_blk = bt * 128 * 4
        f32_tmp = 6 * bt * ts_p * lane_l * 4
        return 2 * (logits_blk + label_blk + out_blk) + f32_tmp

    bt_cands = [c for c in range(1, batch_size + 1) if batch_size % c == 0]
    ts_cands = sorted({seq_len} | {t for t in range(8, seq_len + 1, 8)
                                   if seq_len % t == 0})
    best = None
    for bt in bt_cands:
        for ts in ts_cands:
            if footprint(bt, ts) <= budget_bytes:
                key = (bt * ts, ts, bt)
                if best is None or key > best[0]:
                    best = (key, bt, ts)
    if best is None:                  # best effort: smallest legal block
        return 1, min(ts_cands)
    return best[1], best[2]


def cross_entropy_bound_smooth_loss(logits, label_ids, *, e, d, bound_ids,
                                    batch_size, seq_len, label_num):
    B, S, L, D = int(batch_size), int(seq_len), int(label_num), int(d)
    bound_ids = tuple(sorted({int(b) for b in bound_ids}))

    logits3 = logits.reshape(B, S, L)          # native dtype; cast inside kernel
    labels = label_ids.reshape(B, S).astype(jnp.int32)

    # Lane-packed shifted labels: lab_shift[b, s, D+delta] = labels[b, s+delta]
    # (-1 when s+delta is out of range).  Replaces in-kernel shifts / shift
    # matmuls with plain compares; only 4*(2D+1) bytes per token in HBM.
    padded = jnp.pad(labels, ((0, 0), (D, D)), constant_values=-1)   # (B, S+2D)
    cols = [lax.slice_in_dim(padded, k, k + S, axis=1) for k in range(2 * D + 1)]
    lab_shift = jnp.stack(cols, axis=-1)                             # (B, S, 2D+1)

    vmem_cap = _chip_vmem_bytes()
    vmem_limit = max(32 * 1024 * 1024,
                     min(vmem_cap * 3 // 4, 100 * 1024 * 1024))
    Bt, Ts = _pick_tiles(B, S, L, logits3.dtype.itemsize, D,
                         int(vmem_limit * 0.85))
    Gb, Gs = B // Bt, S // Ts

    kernel = functools.partial(
        _ce_bound_smooth_kernel, e=float(e), d=D, seq_len=S, label_num=L,
        tile_s=Ts, bound_ids=bound_ids)

    partials = pl.pallas_call(
        kernel,
        out_shape=jax.ShapeDtypeStruct((Gs, B, 1, 128), jnp.float32),
        grid_spec=pltpu.PrefetchScalarGridSpec(
            num_scalar_prefetch=0,
            grid=(Gb, Gs),
            in_specs=[
                pl.BlockSpec((Bt, Ts, 2 * D + 1), lambda i, j: (i, j, 0)),
                pl.BlockSpec((Bt, Ts, L), lambda i, j: (i, j, 0)),
            ],
            out_specs=pl.BlockSpec((1, Bt, 1, 128), lambda i, j: (j, i, 0, 0)),
        ),
        compiler_params=pltpu.CompilerParams(
            dimension_semantics=("parallel", "parallel"),
            vmem_limit_bytes=int(vmem_limit)),
    )(lab_shift, logits3)

    # (-t * logp).mean(0).sum() over the (B*S, L) layout == total_sum / (B*S).
    total = jnp.sum(partials[:, :, 0, 0])
    return total * (1.0 / float(B * S))


# --------------------------------------------------------------------------- #
# Reference (NumPy re-implementation of the exact PyTorch forward, float64)
# --------------------------------------------------------------------------- #
def reference_loss(logits, label_ids, e, d, bound_ids, batch_size, seq_len,
                   label_num):
    logits = np.asarray(logits, np.float64)
    lp = logits - logits.max(axis=1, keepdims=True)
    lp = lp - np.log(np.exp(lp).sum(axis=1, keepdims=True))
    targets = np.zeros_like(lp)
    targets[np.arange(lp.shape[0]), np.asarray(label_ids)] = 1.0
    bound_mask = np.zeros((label_num, seq_len))
    bound_mask[np.asarray(bound_ids), :] = 1.0
    smoothed = []
    for i in range(batch_size):
        label_tensor = targets[i * seq_len:(i + 1) * seq_len].T.copy()   # (L, S)
        masked = label_tensor * bound_mask
        idxs = np.argwhere(masked)                  # row-major, like torch.nonzero
        reversed_mask = np.where(bound_mask == 1, 0.0, 1.0)
        reversed_mask = label_tensor * reversed_mask
        for ind in idxs:
            for dd in range(d, 0, -1):
                count = 0
                low = ind[1] - dd
                high = ind[1] + dd
                if low >= 0:
                    count += 1
                if high <= seq_len - 1:
                    count += 1
                if low >= 0:
                    masked[ind[0], low] = e / (d * count)
                if high <= seq_len - 1:
                    masked[ind[0], high] = e / (d * count)
            masked[ind[0], ind[1]] = 1 - e
        smoothed.append((masked + reversed_mask).T)
    sm = np.concatenate(smoothed, axis=0)
    return (-sm * lp).mean(0).sum()


if __name__ == "__main__":
    B, S, L = 2, 16, 16          # batch_size, seq_len, label_num
    E, D = 0.1, 2
    bound_ids = [1, 5]

    key = jax.random.PRNGKey(0)
    k1, k2 = jax.random.split(key)
    logits = jax.random.normal(k1, (B * S, L), jnp.float32)
    label_ids = jax.random.randint(k2, (B * S,), 0, L, jnp.int32)
    # Force some bound labels (incl. adjacent / boundary cases) to exercise smoothing.
    label_ids = label_ids.at[0].set(5).at[3].set(1).at[4].set(1) \
                         .at[15].set(1).at[17].set(5).at[31].set(5)

    loss = cross_entropy_bound_smooth_loss(
        logits, label_ids, e=E, d=D, bound_ids=bound_ids,
        batch_size=B, seq_len=S, label_num=L)
    loss = jax.block_until_ready(loss)

    ref = reference_loss(np.asarray(logits), np.asarray(label_ids),
                         E, D, bound_ids, B, S, L)
    np.testing.assert_allclose(float(loss), float(ref), rtol=1e-4, atol=1e-4)
    print("KERNEL_OK")
</pallas_src>

<mosaic_0001>
module attributes {stable_mosaic.version = 11 : i64} {
  func.func @_ce_bound_smooth_kernel(%arg0: i32, %arg1: i32, %arg2: memref<2x16x5xi32, #tpu.memory_space<vmem>>, %arg3: memref<2x16x16xf32, #tpu.memory_space<vmem>>, %arg4: memref<1x2x1x128xf32, #tpu.memory_space<vmem>>) attributes {dimension_semantics = [#tpu.dimension_semantics<parallel>, #tpu.dimension_semantics<parallel>], iteration_bounds = array<i64: 1, 1>, scalar_prefetch = 0 : i64, scratch_operands = 0 : i64, tpu.core_type = #tpu.core_type<tc>, window_params = [{transform_indices = @transform_0, window_bounds = array<i64: 2, 16, 5>}, {transform_indices = @transform_1, window_bounds = array<i64: 2, 16, 16>}, {transform_indices = @transform_2, window_bounds = array<i64: 1, 2, 1, 128>}]} {
    %c16_i32 = arith.constant 16 : i32
    %0 = arith.muli %arg1, %c16_i32 : i32
    %c0 = arith.constant 0 : index
    %c0_0 = arith.constant 0 : index
    %c0_1 = arith.constant 0 : index
    %1 = vector.load %arg3[%c0, %c0_0, %c0_1] : memref<2x16x16xf32, #tpu.memory_space<vmem>>, vector<2x16x16xf32>
    %cst = arith.constant dense<0xFF800000> : vector<2x16xf32>
    %2 = vector.multi_reduction <maximumf>, %1, %cst [2] : vector<2x16x16xf32> to vector<2x16xf32>
    %3 = vector.shape_cast %2 : vector<2x16xf32> to vector<2x16x1xf32>
    %4 = vector.broadcast %3 : vector<2x16x1xf32> to vector<2x16x16xf32>
    %5 = arith.subf %1, %4 : vector<2x16x16xf32>
    %6 = math.exp %5 : vector<2x16x16xf32>
    %cst_2 = arith.constant dense<0.000000e+00> : vector<2x16xf32>
    %7 = vector.multi_reduction <add>, %6, %cst_2 [2] : vector<2x16x16xf32> to vector<2x16xf32>
    %8 = vector.shape_cast %7 : vector<2x16xf32> to vector<2x16x1xf32>
    %9 = math.log %8 : vector<2x16x1xf32>
    %10 = arith.addf %3, %9 : vector<2x16x1xf32>
    %c0_3 = arith.constant 0 : index
    %c0_4 = arith.constant 0 : index
    %c2 = arith.constant 2 : index
    %11 = vector.load %arg2[%c0_3, %c0_4, %c2] : memref<2x16x5xi32, #tpu.memory_space<vmem>>, vector<2x16x1xi32>
    %12 = tpu.iota {dimensions = array<i32: 2>} : vector<1x1x16xi32>
    %13 = vector.broadcast %11 : vector<2x16x1xi32> to vector<2x16x16xi32>
    %14 = vector.broadcast %12 : vector<1x1x16xi32> to vector<2x16x16xi32>
    %15 = arith.cmpi eq, %13, %14 : vector<2x16x16xi32>
    %cst_5 = arith.constant 0.000000e+00 : f32
    %16 = vector.broadcast %cst_5 : f32 to vector<2x16x16xf32>
    %17 = arith.select %15, %1, %16 : vector<2x16x16xi1>, vector<2x16x16xf32>
    %cst_6 = arith.constant dense<0.000000e+00> : vector<2x16xf32>
    %18 = vector.multi_reduction <add>, %17, %cst_6 [2] : vector<2x16x16xf32> to vector<2x16xf32>
    %19 = vector.shape_cast %18 : vector<2x16xf32> to vector<2x16x1xf32>
    %false = arith.constant false
    %20 = vector.broadcast %false : i1 to vector<2x16x1xi1>
    %c1_i32 = arith.constant 1 : i32
    %21 = vector.broadcast %c1_i32 : i32 to vector<2x16x1xi32>
    %22 = arith.cmpi eq, %11, %21 : vector<2x16x1xi32>
    %23 = arith.ori %20, %22 : vector<2x16x1xi1>
    %c5_i32 = arith.constant 5 : i32
    %24 = vector.broadcast %c5_i32 : i32 to vector<2x16x1xi32>
    %25 = arith.cmpi eq, %11, %24 : vector<2x16x1xi32>
    %26 = arith.ori %23, %25 : vector<2x16x1xi1>
    %27 = arith.subf %10, %19 : vector<2x16x1xf32>
    %cst_7 = arith.constant 0.000000e+00 : f32
    %28 = vector.broadcast %cst_7 : f32 to vector<2x16x1xf32>
    %29 = arith.select %26, %28, %27 : vector<2x16x1xi1>, vector<2x16x1xf32>
    %30 = tpu.iota {dimensions = array<i32: 1>} : vector<1x16x1xi32>
    %31 = vector.broadcast %0 : i32 to vector<1x16x1xi32>
    %32 = arith.addi %31, %30 : vector<1x16x1xi32>
    %cst_8 = arith.constant 0.000000e+00 : f32
    %33 = vector.broadcast %cst_8 : f32 to vector<2x16x1xf32>
    %cst_9 = arith.constant 0.000000e+00 : f32
    %34 = vector.broadcast %cst_9 : f32 to vector<2x16x1xf32>
    %c0_10 = arith.constant 0 : index
    %c0_11 = arith.constant 0 : index
    %c0_12 = arith.constant 0 : index
    %35 = vector.load %arg2[%c0_10, %c0_11, %c0_12] : memref<2x16x5xi32, #tpu.memory_space<vmem>>, vector<2x16x1xi32>
    %c-2_i32 = arith.constant -2 : i32
    %36 = vector.broadcast %c-2_i32 : i32 to vector<1x16x1xi32>
    %37 = arith.addi %32, %36 : vector<1x16x1xi32>
    %c2_i32 = arith.constant 2 : i32
    %38 = vector.broadcast %c2_i32 : i32 to vector<1x16x1xi32>
    %39 = arith.subi %37, %38 : vector<1x16x1xi32>
    %c0_i32 = arith.constant 0 : i32
    %40 = vector.broadcast %c0_i32 : i32 to vector<1x16x1xi32>
    %41 = arith.cmpi sge, %39, %40 : vector<1x16x1xi32>
    %42 = arith.extui %41 : vector<1x16x1xi1> to vector<1x16x1xi32>
    %43 = arith.sitofp %42 : vector<1x16x1xi32> to vector<1x16x1xf32>
    %c2_i32_13 = arith.constant 2 : i32
    %44 = vector.broadcast %c2_i32_13 : i32 to vector<1x16x1xi32>
    %45 = arith.addi %37, %44 : vector<1x16x1xi32>
    %c15_i32 = arith.constant 15 : i32
    %46 = vector.broadcast %c15_i32 : i32 to vector<1x16x1xi32>
    %47 = arith.cmpi sle, %45, %46 : vector<1x16x1xi32>
    %48 = arith.extui %47 : vector<1x16x1xi1> to vector<1x16x1xi32>
    %49 = arith.sitofp %48 : vector<1x16x1xi32> to vector<1x16x1xf32>
    %50 = arith.addf %43, %49 : vector<1x16x1xf32>
    %cst_14 = arith.constant 1.000000e+00 : f32
    %51 = vector.broadcast %cst_14 : f32 to vector<1x16x1xf32>
    %52 = arith.maximumf %50, %51 : vector<1x16x1xf32>
    %cst_15 = arith.constant 2.000000e+00 : f32
    %53 = vector.broadcast %cst_15 : f32 to vector<1x16x1xf32>
    %54 = arith.mulf %53, %52 : vector<1x16x1xf32>
    %cst_16 = arith.constant 1.000000e-01 : f32
    %55 = vector.broadcast %cst_16 : f32 to vector<1x16x1xf32>
    %56 = arith.divf %55, %54 : vector<1x16x1xf32>
    %c1_i32_17 = arith.constant 1 : i32
    %57 = vector.broadcast %c1_i32_17 : i32 to vector<2x16x1xi32>
    %58 = arith.cmpi eq, %35, %57 : vector<2x16x1xi32>
    %59 = vector.shape_cast %56 : vector<1x16x1xf32> to vector<1x16x1xf32>
    %60 = vector.broadcast %59 : vector<1x16x1xf32> to vector<2x16x1xf32>
    %61 = arith.select %58, %60, %33 : vector<2x16x1xi1>, vector<2x16x1xf32>
    %c5_i32_18 = arith.constant 5 : i32
    %62 = vector.broadcast %c5_i32_18 : i32 to vector<2x16x1xi32>
    %63 = arith.cmpi eq, %35, %62 : vector<2x16x1xi32>
    %64 = vector.shape_cast %56 : vector<1x16x1xf32> to vector<1x16x1xf32>
    %65 = vector.broadcast %64 : vector<1x16x1xf32> to vector<2x16x1xf32>
    %66 = arith.select %63, %65, %34 : vector<2x16x1xi1>, vector<2x16x1xf32>
    %c0_19 = arith.constant 0 : index
    %c0_20 = arith.constant 0 : index
    %c1 = arith.constant 1 : index
    %67 = vector.load %arg2[%c0_19, %c0_20, %c1] : memref<2x16x5xi32, #tpu.memory_space<vmem>>, vector<2x16x1xi32>
    %c-1_i32 = arith.constant -1 : i32
    %68 = vector.broadcast %c-1_i32 : i32 to vector<1x16x1xi32>
    %69 = arith.addi %32, %68 : vector<1x16x1xi32>
    %c1_i32_21 = arith.constant 1 : i32
    %70 = vector.broadcast %c1_i32_21 : i32 to vector<1x16x1xi32>
    %71 = arith.subi %69, %70 : vector<1x16x1xi32>
    %c0_i32_22 = arith.constant 0 : i32
    %72 = vector.broadcast %c0_i32_22 : i32 to vector<1x16x1xi32>
    %73 = arith.cmpi sge, %71, %72 : vector<1x16x1xi32>
    %74 = arith.extui %73 : vector<1x16x1xi1> to vector<1x16x1xi32>
    %75 = arith.sitofp %74 : vector<1x16x1xi32> to vector<1x16x1xf32>
    %c1_i32_23 = arith.constant 1 : i32
    %76 = vector.broadcast %c1_i32_23 : i32 to vector<1x16x1xi32>
    %77 = arith.addi %69, %76 : vector<1x16x1xi32>
    %c15_i32_24 = arith.constant 15 : i32
    %78 = vector.broadcast %c15_i32_24 : i32 to vector<1x16x1xi32>
    %79 = arith.cmpi sle, %77, %78 : vector<1x16x1xi32>
    %80 = arith.extui %79 : vector<1x16x1xi1> to vector<1x16x1xi32>
    %81 = arith.sitofp %80 : vector<1x16x1xi32> to vector<1x16x1xf32>
    %82 = arith.addf %75, %81 : vector<1x16x1xf32>
    %cst_25 = arith.constant 1.000000e+00 : f32
    %83 = vector.broadcast %cst_25 : f32 to vector<1x16x1xf32>
    %84 = arith.maximumf %82, %83 : vector<1x16x1xf32>
    %cst_26 = arith.constant 2.000000e+00 : f32
    %85 = vector.broadcast %cst_26 : f32 to vector<1x16x1xf32>
    %86 = arith.mulf %85, %84 : vector<1x16x1xf32>
    %cst_27 = arith.constant 1.000000e-01 : f32
    %87 = vector.broadcast %cst_27 : f32 to vector<1x16x1xf32>
    %88 = arith.divf %87, %86 : vector<1x16x1xf32>
    %c1_i32_28 = arith.constant 1 : i32
    %89 = vector.broadcast %c1_i32_28 : i32 to vector<2x16x1xi32>
    %90 = arith.cmpi eq, %67, %89 : vector<2x16x1xi32>
    %91 = vector.shape_cast %88 : vector<1x16x1xf32> to vector<1x16x1xf32>
    %92 = vector.broadcast %91 : vector<1x16x1xf32> to vector<2x16x1xf32>
    %93 = arith.select %90, %92, %61 : vector<2x16x1xi1>, vector<2x16x1xf32>
    %c5_i32_29 = arith.constant 5 : i32
    %94 = vector.broadcast %c5_i32_29 : i32 to vector<2x16x1xi32>
    %95 = arith.cmpi eq, %67, %94 : vector<2x16x1xi32>
    %96 = vector.shape_cast %88 : vector<1x16x1xf32> to vector<1x16x1xf32>
    %97 = vector.broadcast %96 : vector<1x16x1xf32> to vector<2x16x1xf32>
    %98 = arith.select %95, %97, %66 : vector<2x16x1xi1>, vector<2x16x1xf32>
    %c0_30 = arith.constant 0 : index
    %c0_31 = arith.constant 0 : index
    %c2_32 = arith.constant 2 : index
    %99 = vector.load %arg2[%c0_30, %c0_31, %c2_32] : memref<2x16x5xi32, #tpu.memory_space<vmem>>, vector<2x16x1xi32>
    %c1_i32_33 = arith.constant 1 : i32
    %100 = vector.broadcast %c1_i32_33 : i32 to vector<2x16x1xi32>
    %101 = arith.cmpi eq, %99, %100 : vector<2x16x1xi32>
    %cst_34 = arith.constant 0.899999976 : f32
    %102 = vector.broadcast %cst_34 : f32 to vector<2x16x1xf32>
    %103 = arith.select %101, %102, %93 : vector<2x16x1xi1>, vector<2x16x1xf32>
    %c5_i32_35 = arith.constant 5 : i32
    %104 = vector.broadcast %c5_i32_35 : i32 to vector<2x16x1xi32>
    %105 = arith.cmpi eq, %99, %104 : vector<2x16x1xi32>
    %cst_36 = arith.constant 0.899999976 : f32
    %106 = vector.broadcast %cst_36 : f32 to vector<2x16x1xf32>
    %107 = arith.select %105, %106, %98 : vector<2x16x1xi1>, vector<2x16x1xf32>
    %c0_37 = arith.constant 0 : index
    %c0_38 = arith.constant 0 : index
    %c3 = arith.constant 3 : index
    %108 = vector.load %arg2[%c0_37, %c0_38, %c3] : memref<2x16x5xi32, #tpu.memory_space<vmem>>, vector<2x16x1xi32>
    %c1_i32_39 = arith.constant 1 : i32
    %109 = vector.broadcast %c1_i32_39 : i32 to vector<1x16x1xi32>
    %110 = arith.addi %32, %109 : vector<1x16x1xi32>
    %c1_i32_40 = arith.constant 1 : i32
    %111 = vector.broadcast %c1_i32_40 : i32 to vector<1x16x1xi32>
    %112 = arith.subi %110, %111 : vector<1x16x1xi32>
    %c0_i32_41 = arith.constant 0 : i32
    %113 = vector.broadcast %c0_i32_41 : i32 to vector<1x16x1xi32>
    %114 = arith.cmpi sge, %112, %113 : vector<1x16x1xi32>
    %115 = arith.extui %114 : vector<1x16x1xi1> to vector<1x16x1xi32>
    %116 = arith.sitofp %115 : vector<1x16x1xi32> to vector<1x16x1xf32>
    %c1_i32_42 = arith.constant 1 : i32
    %117 = vector.broadcast %c1_i32_42 : i32 to vector<1x16x1xi32>
    %118 = arith.addi %110, %117 : vector<1x16x1xi32>
    %c15_i32_43 = arith.constant 15 : i32
    %119 = vector.broadcast %c15_i32_43 : i32 to vector<1x16x1xi32>
    %120 = arith.cmpi sle, %118, %119 : vector<1x16x1xi32>
    %121 = arith.extui %120 : vector<1x16x1xi1> to vector<1x16x1xi32>
    %122 = arith.sitofp %121 : vector<1x16x1xi32> to vector<1x16x1xf32>
    %123 = arith.addf %116, %122 : vector<1x16x1xf32>
    %cst_44 = arith.constant 1.000000e+00 : f32
    %124 = vector.broadcast %cst_44 : f32 to vector<1x16x1xf32>
    %125 = arith.maximumf %123, %124 : vector<1x16x1xf32>
    %cst_45 = arith.constant 2.000000e+00 : f32
    %126 = vector.broadcast %cst_45 : f32 to vector<1x16x1xf32>
    %127 = arith.mulf %126, %125 : vector<1x16x1xf32>
    %cst_46 = arith.constant 1.000000e-01 : f32
    %128 = vector.broadcast %cst_46 : f32 to vector<1x16x1xf32>
    %129 = arith.divf %128, %127 : vector<1x16x1xf32>
    %c1_i32_47 = arith.constant 1 : i32
    %130 = vector.broadcast %c1_i32_47 : i32 to vector<2x16x1xi32>
    %131 = arith.cmpi eq, %108, %130 : vector<2x16x1xi32>
    %132 = vector.shape_cast %129 : vector<1x16x1xf32> to vector<1x16x1xf32>
    %133 = vector.broadcast %132 : vector<1x16x1xf32> to vector<2x16x1xf32>
    %134 = arith.select %131, %133, %103 : vector<2x16x1xi1>, vector<2x16x1xf32>
    %c5_i32_48 = arith.constant 5 : i32
    %135 = vector.broadcast %c5_i32_48 : i32 to vector<2x16x1xi32>
    %136 = arith.cmpi eq, %108, %135 : vector<2x16x1xi32>
    %137 = vector.shape_cast %129 : vector<1x16x1xf32> to vector<1x16x1xf32>
    %138 = vector.broadcast %137 : vector<1x16x1xf32> to vector<2x16x1xf32>
    %139 = arith.select %136, %138, %107 : vector<2x16x1xi1>, vector<2x16x1xf32>
    %c0_49 = arith.constant 0 : index
    %c0_50 = arith.constant 0 : index
    %c4 = arith.constant 4 : index
    %140 = vector.load %arg2[%c0_49, %c0_50, %c4] : memref<2x16x5xi32, #tpu.memory_space<vmem>>, vector<2x16x1xi32>
    %c2_i32_51 = arith.constant 2 : i32
    %141 = vector.broadcast %c2_i32_51 : i32 to vector<1x16x1xi32>
    %142 = arith.addi %32, %141 : vector<1x16x1xi32>
    %c2_i32_52 = arith.constant 2 : i32
    %143 = vector.broadcast %c2_i32_52 : i32 to vector<1x16x1xi32>
    %144 = arith.subi %142, %143 : vector<1x16x1xi32>
    %c0_i32_53 = arith.constant 0 : i32
    %145 = vector.broadcast %c0_i32_53 : i32 to vector<1x16x1xi32>
    %146 = arith.cmpi sge, %144, %145 : vector<1x16x1xi32>
    %147 = arith.extui %146 : vector<1x16x1xi1> to vector<1x16x1xi32>
    %148 = arith.sitofp %147 : vector<1x16x1xi32> to vector<1x16x1xf32>
    %c2_i32_54 = arith.constant 2 : i32
    %149 = vector.broadcast %c2_i32_54 : i32 to vector<1x16x1xi32>
    %150 = arith.addi %142, %149 : vector<1x16x1xi32>
    %c15_i32_55 = arith.constant 15 : i32
    %151 = vector.broadcast %c15_i32_55 : i32 to vector<1x16x1xi32>
    %152 = arith.cmpi sle, %150, %151 : vector<1x16x1xi32>
    %153 = arith.extui %152 : vector<1x16x1xi1> to vector<1x16x1xi32>
    %154 = arith.sitofp %153 : vector<1x16x1xi32> to vector<1x16x1xf32>
    %155 = arith.addf %148, %154 : vector<1x16x1xf32>
    %cst_56 = arith.constant 1.000000e+00 : f32
    %156 = vector.broadcast %cst_56 : f32 to vector<1x16x1xf32>
    %157 = arith.maximumf %155, %156 : vector<1x16x1xf32>
    %cst_57 = arith.constant 2.000000e+00 : f32
    %158 = vector.broadcast %cst_57 : f32 to vector<1x16x1xf32>
    %159 = arith.mulf %158, %157 : vector<1x16x1xf32>
    %cst_58 = arith.constant 1.000000e-01 : f32
    %160 = vector.broadcast %cst_58 : f32 to vector<1x16x1xf32>
    %161 = arith.divf %160, %159 : vector<1x16x1xf32>
    %c1_i32_59 = arith.constant 1 : i32
    %162 = vector.broadcast %c1_i32_59 : i32 to vector<2x16x1xi32>
    %163 = arith.cmpi eq, %140, %162 : vector<2x16x1xi32>
    %164 = vector.shape_cast %161 : vector<1x16x1xf32> to vector<1x16x1xf32>
    %165 = vector.broadcast %164 : vector<1x16x1xf32> to vector<2x16x1xf32>
    %166 = arith.select %163, %165, %134 : vector<2x16x1xi1>, vector<2x16x1xf32>
    %c5_i32_60 = arith.constant 5 : i32
    %167 = vector.broadcast %c5_i32_60 : i32 to vector<2x16x1xi32>
    %168 = arith.cmpi eq, %140, %167 : vector<2x16x1xi32>
    %169 = vector.shape_cast %161 : vector<1x16x1xf32> to vector<1x16x1xf32>
    %170 = vector.broadcast %169 : vector<1x16x1xf32> to vector<2x16x1xf32>
    %171 = arith.select %168, %170, %139 : vector<2x16x1xi1>, vector<2x16x1xf32>
    %c0_61 = arith.constant 0 : index
    %c0_62 = arith.constant 0 : index
    %c1_63 = arith.constant 1 : index
    %172 = vector.load %arg3[%c0_61, %c0_62, %c1_63] : memref<2x16x16xf32, #tpu.memory_space<vmem>>, vector<2x16x1xf32>
    %173 = arith.subf %10, %172 : vector<2x16x1xf32>
    %174 = arith.mulf %166, %173 : vector<2x16x1xf32>
    %175 = arith.addf %29, %174 : vector<2x16x1xf32>
    %c0_64 = arith.constant 0 : index
    %c0_65 = arith.constant 0 : index
    %c5 = arith.constant 5 : index
    %176 = vector.load %arg3[%c0_64, %c0_65, %c5] : memref<2x16x16xf32, #tpu.memory_space<vmem>>, vector<2x16x1xf32>
    %177 = arith.subf %10, %176 : vector<2x16x1xf32>
    %178 = arith.mulf %171, %177 : vector<2x16x1xf32>
    %179 = arith.addf %175, %178 : vector<2x16x1xf32>
    %cst_66 = arith.constant dense<0.000000e+00> : vector<2x1xf32>
    %180 = vector.multi_reduction <add>, %179, %cst_66 [1] : vector<2x16x1xf32> to vector<2x1xf32>
    %181 = vector.shape_cast %180 : vector<2x1xf32> to vector<2x1x1xf32>
    %182 = vector.shape_cast %181 : vector<2x1x1xf32> to vector<1x2x1x1xf32>
    %183 = vector.shape_cast %182 : vector<1x2x1x1xf32> to vector<1x2x1x1xf32>
    %184 = vector.broadcast %183 : vector<1x2x1x1xf32> to vector<1x2x1x128xf32>
    %c0_67 = arith.constant 0 : index
    %c0_68 = arith.constant 0 : index
    %c0_69 = arith.constant 0 : index
    %c0_70 = arith.constant 0 : index
    %185 = vector.load %arg4[%c0_67, %c0_68, %c0_69, %c0_70] : memref<1x2x1x128xf32, #tpu.memory_space<vmem>>, vector<1x2x1x128xf32>
    tpu.vector_store %arg4[%c0_67, %c0_68, %c0_69, %c0_70], %184 {strides = array<i32>} : memref<1x2x1x128xf32, #tpu.memory_space<vmem>>, vector<1x2x1x128xf32>,
    return
  }
  func.func @transform_0(%arg0: i32, %arg1: i32) -> (i32, i32, i32) {
    %c0_i32 = arith.constant 0 : i32
    %c0_i32_0 = arith.constant 0 : i32
    return %arg0, %arg1, %c0_i32 : i32, i32, i32
  }
  func.func @transform_1(%arg0: i32, %arg1: i32) -> (i32, i32, i32) {
    %c0_i32 = arith.constant 0 : i32
    %c0_i32_0 = arith.constant 0 : i32
    return %arg0, %arg1, %c0_i32 : i32, i32, i32
  }
  func.func @transform_2(%arg0: i32, %arg1: i32) -> (i32, i32, i32, i32) {
    %c0_i32 = arith.constant 0 : i32
    %c0_i32_0 = arith.constant 0 : i32
    %c0_i32_1 = arith.constant 0 : i32
    return %arg1, %arg0, %c0_i32, %c0_i32_0 : i32, i32, i32, i32
  }
}

</mosaic_0001>

<bundles_post_ra>
// kernel: tpu_custom_call.1
= control target key start
LH: loop header
LB: loop body
LE: loop exit
PB: predicated region body
PF: predicated region fallthrough
CT: control target
= control target key end

     0   :  { %v70_v0 = vlaneseq  ;;  %v705_v1 = vmov 4.0   ;;  %s1082_s0 = inlined_call_operand.vmem [shape: s32[2,16,5], index: 0, kind: input, shape index: {}]   ;;  %s1083_s1 = inlined_call_operand.vmem [shape: f32[2,16,16], index: 1, kind: input, shape index: {}]   ;;  %s1084_s2 = inlined_call_operand.hbm [shape: f32[1,2,1,128], index: 2, kind: output, shape index: {}]  }
   0x1   :  { %653 = vrcp.f32 %v705_v1 }
   0x2   :  { %7 = vsyncpa [#allocation3], 0  ;;  %v730_v2 = vshrl.u32 %v70_v0, 7  ;;  %v706_v7 = vmov 0.0   ;;  %v737_v11 = vld [vmem:[%s1082_s0 + $0x18] sm:$0xff]  ;;  %v742_v14 = vld [vmem:[%s1082_s0 + $0x8] sm:$0xff] }
   0x3   :  { %vm107_vm2 = vcmp.eq.s32.totalorder %v737_v11, 1  ;;  %vm109_vm3 = vcmp.eq.s32.totalorder %v742_v14, 5  ;;  %vm105_vm4 = vcmp.eq.s32.totalorder %v742_v14, 1  ;;  %s707_s13 = smov 1   ;;  %vm111_vm5 = vcmp.eq.s32.totalorder %v737_v11, 5  ;;  %v769_v30 = vld [vmem:[%s1082_s0 + $0x10] sm:$0xff] }
   0x4   :  { %v130_v3 = vadd.s32 4294967294, %v730_v2  ;;  %v774_v32 = vld [vmem:[%s1082_s0] sm:$0xff]  ;;  %vm106_vm10 = vcmp.eq.s32.totalorder %v769_v30, 1  ;;  %vm110_vm13 = vcmp.eq.s32.totalorder %v769_v30, 5  ;;  %vm17_vm14 = vcmask 130048   ;;  %v800_v41 = vld [vmem:[%s1083_s1 + $0x10] sm:$0xff] }
   0x5   :  { %vm108_vm11 = vcmp.eq.s32.totalorder %v774_v32, 5  ;;  %vm104_vm12 = vcmp.eq.s32.totalorder %v774_v32, 1  ;;  %v795_v40 = vld [vmem:[%s1083_s1] sm:$0xff]  ;;  %v24_v43 = vsel %vm17_vm14, %v800_v41, -inf  ;;  %v809_v44 = vld [vmem:[%s1083_s1 + $0x18] sm:$0xff]  ;;  %v814_v45 = vld [vmem:[%s1083_s1 + $0x8] sm:$0xff] }
   0x6   :  { %v633_v4 = vadd.s32 4294967294, %v130_v3  ;;  %v18_v42 = vsel %vm17_vm14, %v795_v40, -inf  ;;  %v27_v46 = vsel %vm17_vm14, %v809_v44, -inf  ;;  %v21_v47 = vsel %vm17_vm14, %v814_v45, -inf  ;;  %s709_s1 = smov 3   ;;  %s710_s25 = smov 127  }
   0x7   :  { %v654_v5 = vpop.eup %653  ;;  %v708_v55 = vmov 2   ;;  %v192_v56 = vadd.s32 4294967295, %v730_v2  ;;  %s711_s26 = smov 126   ;;  %s712_s27 = smov [#allocation2]  }
   0x8   :  { %v170_v6 = vmul.f32 4.0, %v654_v5  ;;  %vm134_vm0 = vcmp.ge.s32.totalorder %v633_v4, 0  ;;  %vm175_vm1 = vweird.f32 %v654_v5  ;;  %652 = vset.pattern.permute.xlu2 %v708_v55  ;;  %651 = vset.pattern.permute.xlu1 %v708_v55  ;;  %s619_s28 = sshll.u32 %s712_s27, 4  ;;  %s621_s3 = sshll.u32 %s1084_s2, 4  ;;  %s620_s28 = int_to_ptr.vmem [resolvable:$true] %s619_s28  ;;  %s622_s3 = int_to_ptr.hbm [resolvable:$true] %s621_s3 }
   0x9   :  { %v635_v8 = vsel %vm134_vm0, 1.0, %v706_v7  ;;  %650 = vset.pattern.permute.xlu0 %v708_v55  ;;  %v636_v57 = vadd.s32 4294967295, %v192_v56  ;;  %s713_s4 = smov 16  }
   0xa   :  { %v171_v9 = vsub.f32 1.0, %v170_v6  ;;  %v148_v10 = vadd.f32 1.0, %v635_v8 }
   0xb   :  { %vm196_vm15 = vcmp.ge.s32.totalorder %v636_v57, 0 }
   0xc   :  { %v172_v12 = vmul.f32 %v654_v5, %v171_v9  ;;  %v150_v13 = vmax.f32 %v148_v10, 1.0  ;;  %v638_v1 = vsel %vm196_vm15, 1.0, %v706_v7 }
   0xd   :  { %v210_v4 = vadd.f32 1.0, %v638_v1 }
   0xe   :  { %v173_v15 = vadd.f32 %v654_v5, %v172_v12  ;;  %v152_v16 = vmul.f32 2.0, %v150_v13 }
   0xf   :  { %v212_v9 = vmax.f32 %v210_v4, 1.0 }
  0x10   :  { %v177_v17 = vsel %vm175_vm1, %v654_v5, %v173_v15  ;;  %655 = vrcp.f32 %v152_v16  ;;  %vm159_vm6 = vweird.f32 %v152_v16  ;;  %v165_v24 = vand.u32 2147483648, %v152_v16 }
  0x11   :  { %v747_v18 = vmul.f32 0.1, %v177_v17  ;;  %v163_v27 = vand.u32 2147483647, %v152_v16 }
  0x12   :  { %v166_v29 = vor.u32 1.1754944e-38, %v165_v24 }
  0x13   :  { %v187_v19 = vsel %vm107_vm2, %v747_v18, 0.0  ;;  %v189_v20 = vsel %vm109_vm3, %v747_v18, 0.0  ;;  %v185_v21 = vsel %vm105_vm4, %v747_v18, 0.0  ;;  %v191_v25 = vsel %vm111_vm5, %v747_v18, 0.0 }
  0x14   :  { %256 = vrot.lane.b32.xlu1 %v187_v19, %s707_s13  ;;  %272 = vrot.lane.b32.xlu2 %v189_v20, %s707_s13  ;;  %vm164_vm9 = vcmp.eq.f32.partialorder %v163_v27, 8.507059e+37  ;;  %v214_v20 = vmul.f32 2.0, %v212_v9 }
  0x15   :  { %252 = vrot.lane.b32.xlu0 %v185_v21, %s707_s13 }
  0x16   :  { %v656_v22 = vpop.eup %655  ;;  %vm221_vm0 = vweird.f32 %v214_v20 }
  0x17   :  { %v155_v23 = vmul.f32 %v656_v22, %v152_v16  ;;  %vm160_vm7 = vweird.f32 %v656_v22 }
  0x18   :  { %vm161_vm8 = vmor %vm159_vm6, %vm160_vm7 }
  0x19   :  { %v156_v26 = vsub.f32 1.0, %v155_v23 }
  0x1b   :  { %v157_v28 = vmul.f32 %v656_v22, %v156_v26 }
  0x1c   :  { %276 = vrot.lane.b32.xlu1 %v191_v25, %s707_s13 }
  0x1d   :  { %v158_v31 = vadd.f32 %v656_v22, %v157_v28 }
  0x1f   :  { %v162_v33 = vsel %vm161_vm8, %v656_v22, %v158_v31 }
  0x20   :  { %v167_v34 = vsel %vm164_vm9, %v166_v29, %v162_v33  ;;  %v227_v29 = vand.u32 2147483648, %v214_v20  ;;  %v225_v33 = vand.u32 2147483647, %v214_v20 }
  0x21   :  { %v168_v35 = vmul.f32 0.1, %v167_v34 }
  0x22   :  { %vm226_vm7 = vcmp.eq.f32.partialorder %v225_v33, 8.507059e+37 }
  0x23   :  { %v186_v36 = vsel %vm106_vm10, %v168_v35, 0.0  ;;  %v188_v37 = vsel %vm108_vm11, %v168_v35, 0.0  ;;  %v184_v38 = vsel %vm104_vm12, %v168_v35, 0.0  ;;  %v190_v39 = vsel %vm110_vm13, %v168_v35, 0.0 }
  0x24   :  { %254 = vrot.lane.b32.xlu1 %v186_v36, %s707_s13  ;;  %270 = vrot.lane.b32.xlu2 %v188_v37, %s707_s13  ;;  %v228_v35 = vor.u32 1.1754944e-38, %v227_v29 }
  0x25   :  { %250 = vrot.lane.b32.xlu0 %v184_v38, %s707_s13 }
  0x2d   :  { %274 = vrot.lane.b32.xlu0 %v190_v39, %s707_s13 }
  0x4d   :  { %19 = vmax.xlane.f32.xlu2 %v18_v42 }
  0x4e   :  { %25 = vmax.xlane.f32.xlu1 %v24_v43 }
  0x55   :  { %28 = vmax.xlane.f32.xlu2 %v27_v46 }
  0x57   :  { %22 = vmax.xlane.f32.xlu0 %v21_v47 }
  0x6e   :  { %v824_v51 = vpop.permute.xlu2 %272 }
  0x6f   :  { %v283_v46 = vsel %vm109_vm3, %v747_v18, %v824_v51  ;;  %v896_v51 = vand.u32 127, %v70_v0 }
  0x7e   :  { %v830_v54 = vpop.permute.xlu2 %270 }
  0x86   :  { %v820_v48 = vpop.permute.xlu1 %256 }
  0x87   :  { %v253_v50 = vpop.permute.xlu0 %252  ;;  %v265_v42 = vsel %vm107_vm2, %v747_v18, %v820_v48 }
  0x88   :  { %v263_v34 = vsel %vm105_vm4, %v747_v18, %v253_v50 }
  0x8e   :  { %v822_v49 = vpop.permute.xlu1 %276 }
  0x8f   :  { %v285_v37 = vsel %vm111_vm5, %v747_v18, %v822_v49 }
  0x96   :  { %v826_v52 = vpop.permute.xlu1 %254 }
  0x97   :  { %v828_v53 = vpop.permute.xlu0 %250 }
  0x9f   :  { %v839_v61 = vpop.permute.xlu0 %274 }
  0xc0   :  { %v833_v58 = vpop.xlane.xlu2 %19 }
  0xc1   :  { %v30_v59 = vsub.f32 %v795_v40, %v833_v58  ;;  %v837_v60 = vpop.xlane.xlu1 %25 }
  0xc2   :  { %v32_v62 = vsub.f32 %v800_v41, %v837_v60 }
  0xc3   :  { %v34_v63 = vmul.f32 1.442695, %v30_v59 }
  0xc4   :  { %v38_v3 = vmul.f32 1.442695, %v32_v62 }
  0xc5   :  { %657 = vpow2.f32 %v34_v63 }
  0xc6   :  { %659 = vpow2.f32 %v38_v3 }
  0xc8   :  { %v844_v5 = vpop.xlane.xlu2 %28 }
  0xc9   :  { %v33_v6 = vsub.f32 %v809_v44, %v844_v5 }
  0xca   :  { %v848_v8 = vpop.xlane.xlu0 %22 }
  0xcb   :  { %v658_v10 = vpop.eup %657  ;;  %v40_v12 = vmul.f32 1.442695, %v33_v6  ;;  %v31_v13 = vsub.f32 %v814_v45, %v848_v8 }
  0xcc   :  { %v660_v15 = vpop.eup %659  ;;  %v42_v16 = vsel %vm17_vm14, %v658_v10, 0.0 }
  0xcd   :  { %661 = vpow2.f32 %v40_v12  ;;  %v36_v17 = vmul.f32 1.442695, %v31_v13  ;;  %43 = vadd.xlane.f32.xlu1 %v42_v16  ;;  %v48_v19 = vsel %vm17_vm14, %v660_v15, 0.0 }
  0xce   :  { %49 = vadd.xlane.f32.xlu2 %v48_v19 }
  0xcf   :  { %663 = vpow2.f32 %v36_v17 }
  0xd0   :  { %665 = vrcp.f32 %v214_v20 }
  0xd3   :  { %v662_v21 = vpop.eup %661 }
  0xd4   :  { %v51_v22 = vsel %vm17_vm14, %v662_v21, 0.0 }
  0xd5   :  { %v664_v23 = vpop.eup %663  ;;  %52 = vadd.xlane.f32.xlu1 %v51_v22 }
  0xd6   :  { %v45_v24 = vsel %vm17_vm14, %v664_v23, 0.0  ;;  %v666_v25 = vpop.eup %665 }
  0xd7   :  { %46 = vadd.xlane.f32.xlu0 %v45_v24  ;;  %v217_v26 = vmul.f32 %v666_v25, %v214_v20  ;;  %vm222_vm1 = vweird.f32 %v666_v25 }
  0xd8   :  { %vm223_vm6 = vmor %vm221_vm0, %vm222_vm1 }
  0xd9   :  { %v218_v27 = vsub.f32 1.0, %v217_v26 }
  0xdb   :  { %v219_v28 = vmul.f32 %v666_v25, %v218_v27 }
  0xdd   :  { %v220_v31 = vadd.f32 %v666_v25, %v219_v28  ;;  %v946_v28 = vadd.s32 8, %v730_v2 }
  0xdf   :  { %v224_v36 = vsel %vm223_vm6, %v666_v25, %v220_v31 }
  0xe0   :  { %v229_v38 = vsel %vm226_vm7, %v228_v35, %v224_v36 }
  0xe1   :  { %v230_v39 = vmul.f32 0.1, %v229_v38 }
  0xe3   :  { %v262_v43 = vsel %vm104_vm12, %v230_v39, %v828_v53  ;;  %v282_v47 = vsel %vm108_vm11, %v230_v39, %v830_v54  ;;  %v264_v48 = vsel %vm106_vm10, %v230_v39, %v826_v52  ;;  %v284_v49 = vsel %vm110_vm13, %v230_v39, %v839_v61 }
  0xe6   :  { %79 = vperm.xlu2 %652, %v769_v30  }
  0xeb   :  { %292 = vrot.lane.b32.xlu0 %v263_v34, %s707_s13 }
  0xee   :  { %316 = vrot.lane.b32.xlu2 %v285_v37, %s707_s13  ;;  %76 = vperm.xlu1 %651, %v742_v14  }
  0xf3   :  { %296 = vrot.lane.b32.xlu0 %v265_v42, %s707_s13 }
  0xf6   :  { %290 = vrot.lane.b32.xlu2 %v262_v43, %s707_s13  ;;  %312 = vrot.lane.b32.xlu1 %v283_v46, %s707_s13 }
  0xfb   :  { %73 = vperm.xlu0 %650, %v774_v32  }
  0xfe   :  { %310 = vrot.lane.b32.xlu2 %v282_v47, %s707_s13  ;;  %294 = vrot.lane.b32.xlu1 %v264_v48, %s707_s13 }
 0x103   :  { %314 = vrot.lane.b32.xlu0 %v284_v49, %s707_s13 }
 0x106   :  { %82 = vperm.xlu1 %651, %v737_v11  }
 0x140   :  { %v44_v52 = vpop.xlane.xlu1 %43 }
 0x141   :  { %v50_v50 = vpop.xlane.xlu2 %49 }
 0x148   :  { %v53_v62 = vpop.xlane.xlu1 %52 }
 0x149   :  { %v898_v53 = vpop.permute.xlu2 %79 }
 0x14a   :  { %v47_v54 = vpop.xlane.xlu0 %46  ;;  %vm86_vm8 = vcmp.eq.s32.totalorder %v898_v53, %v896_v51 }
 0x14b   :  { %667 = vlog2.f32 %v47_v54 }
 0x14c   :  { %669 = vlog2.f32 %v50_v50 }
 0x14d   :  { %671 = vlog2.f32 %v44_v52 }
 0x14e   :  { %673 = vlog2.f32 %v53_v62 }
 0x151   :  { %v668_v55 = vpop.eup %667 }
 0x152   :  { %v57_v56 = vmul.f32 0.6931472, %v668_v55  ;;  %v670_v57 = vpop.eup %669 }
 0x153   :  { %v59_v61 = vmul.f32 0.6931472, %v670_v57  ;;  %v672_v12 = vpop.eup %671 }
 0x154   :  { %v903_v59 = vadd.f32 %v57_v56, %v848_v8  ;;  %v317_v8 = vpop.permute.xlu2 %316  ;;  %v55_v13 = vmul.f32 0.6931472, %v672_v12  ;;  %v674_v22 = vpop.eup %673 }
 0x155   :  { %v912_v63 = vadd.f32 %v59_v61, %v837_v60  ;;  %v325_v9 = vsel %vm111_vm5, 0.9, %v317_v8  ;;  %v61_v23 = vmul.f32 0.6931472, %v674_v22 }
 0x156   :  { %v907_v0 = vsub.f32 %v903_v59, %v814_v45  ;;  %v932_v20 = vadd.f32 %v55_v13, %v833_v58 }
 0x157   :  { %v506_v4 = vsub.f32 %v912_v63, %v800_v41  ;;  %v941_v26 = vadd.f32 %v61_v23, %v844_v5 }
 0x158   :  { %514 = vrot.lane.b32.xlu1 %v907_v0, %s709_s1  ;;  %v504_v24 = vsub.f32 %v932_v20, %v795_v40 }
 0x159   :  { %v507_v29 = vsub.f32 %v941_v26, %v809_v44 }
 0x15c   :  { %v291_v27 = vpop.permute.xlu2 %290 }
 0x15d   :  { %v293_v1 = vpop.permute.xlu0 %292  ;;  %v302_v48 = vsel %vm104_vm12, 0.9, %v291_v27 }
 0x15e   :  { %v303_v3 = vsel %vm105_vm4, 0.9, %v293_v1 }
 0x15f   :  { %384 = vrot.lane.b32.xlu2 %v303_v3, %s707_s13 }
 0x160   :  { %552 = vrot.lane.b32.xlu1 %v506_v4, %s710_s25  ;;  %v920_v6 = vpop.permute.xlu1 %76 }
 0x161   :  { %vm85_vm9 = vcmp.eq.s32.totalorder %v920_v6, %v896_v51 }
 0x164   :  { %v311_v33 = vpop.permute.xlu2 %310 }
 0x165   :  { %v297_v60 = vpop.permute.xlu0 %296  ;;  %v322_v2 = vsel %vm108_vm11, 0.9, %v311_v33 }
 0x166   :  { %v305_v5 = vsel %vm107_vm2, 0.9, %v297_v60 }
 0x167   :  { %408 = vrot.lane.b32.xlu2 %v325_v9, %s707_s13 }
 0x168   :  { %v313_v10 = vpop.permute.xlu1 %312 }
 0x169   :  { %v323_v36 = vsel %vm109_vm3, 0.9, %v313_v10 }
 0x16d   :  { %v74_v15 = vpop.permute.xlu0 %73 }
 0x16e   :  { %vm84_vm15 = vcmp.eq.s32.totalorder %v74_v15, %v896_v51 }
 0x16f   :  { %516 = vrot.lane.b32.xlu2 %v506_v4, %s709_s1  ;;  %v88_v16 = vsel %vm84_vm15, %v795_v40, 0.0  ;;  %v327_v40 = vadd.s32 1, %v946_v28 }
 0x170   :  { %v92_v17 = vsel %vm17_vm14, %v88_v16, 0.0  ;;  %v295_v19 = vpop.permute.xlu1 %294 }
 0x171   :  { %93 = vadd.xlane.f32.xlu0 %v92_v17  ;;  %v304_v21 = vsel %vm106_vm10, 0.9, %v295_v19  ;;  %v335_v31 = vadd.s32 1, %v327_v40 }
 0x172   :  { %386 = vrot.lane.b32.xlu1 %v304_v21, %s707_s13 }
 0x173   :  { %vm337_vm0 = vcmp.le.s32.totalorder %v335_v31, 15 }
 0x174   :  { %v639_v34 = vsel %vm337_vm0, 1.0, %v706_v7 }
 0x175   :  { %v315_v25 = vpop.permute.xlu0 %314  ;;  %v343_v35 = vadd.f32 1.0, %v639_v34 }
 0x176   :  { %v324_v58 = vsel %vm110_vm13, 0.9, %v315_v25 }
 0x177   :  { %548 = vrot.lane.b32.xlu2 %v504_v24, %s710_s25  ;;  %v345_v37 = vmax.f32 %v343_v35, 1.0 }
 0x178   :  { %v83_v1 = vpop.permute.xlu1 %82 }
 0x179   :  { %v347_v38 = vmul.f32 2.0, %v345_v37  ;;  %vm87_vm0 = vcmp.eq.s32.totalorder %v83_v1, %v896_v51 }
 0x17a   :  { %406 = vrot.lane.b32.xlu1 %v324_v58, %s707_s13  ;;  %v91_v58 = vsel %vm87_vm0, %v809_v44, 0.0 }
 0x17b   :  { %675 = vrcp.f32 %v347_v38  ;;  %vm368_vm1 = vweird.f32 %v347_v38  ;;  %v374_v47 = vand.u32 2147483648, %v347_v38  ;;  %v372_v50 = vand.u32 2147483647, %v347_v38 }
 0x17c   :  { %v101_v31 = vsel %vm17_vm14, %v91_v58, 0.0 }
 0x17d   :  { %v375_v54 = vor.u32 1.1754944e-38, %v374_v47  ;;  %vm373_vm15 = vcmp.eq.f32.partialorder %v372_v50, 8.507059e+37 }
 0x17f   :  { %554 = vrot.lane.b32.xlu2 %v507_v29, %s710_s25 }
 0x181   :  { %v676_v39 = vpop.eup %675 }
 0x182   :  { %v364_v42 = vmul.f32 %v676_v39, %v347_v38  ;;  %vm369_vm6 = vweird.f32 %v676_v39 }
 0x183   :  { %vm370_vm7 = vmor %vm368_vm1, %vm369_vm6 }
 0x184   :  { %v365_v43 = vsub.f32 1.0, %v364_v42 }
 0x185   :  { %388 = vrot.lane.b32.xlu0 %v305_v5, %s707_s13  ;;  %v419_v5 = vadd.s32 2, %v946_v28  ;;  %v90_v28 = vsel %vm86_vm8, %v800_v41, 0.0  ;;  %vm112_vm8 = vmor %vm104_vm12, %vm108_vm11 }
 0x186   :  { %v366_v46 = vmul.f32 %v676_v39, %v365_v43 }
 0x187   :  { %402 = vrot.lane.b32.xlu2 %v322_v2, %s707_s13  ;;  %v421_v2 = vadd.s32 2, %v419_v5 }
 0x188   :  { %v367_v49 = vadd.f32 %v676_v39, %v366_v46 }
 0x189   :  { %vm423_vm1 = vcmp.le.s32.totalorder %v421_v2, 15 }
 0x18a   :  { %v371_v52 = vsel %vm370_vm7, %v676_v39, %v367_v49 }
 0x18b   :  { %v376_v55 = vsel %vm373_vm15, %v375_v54, %v371_v52 }
 0x18c   :  { %v377_v56 = vmul.f32 0.1, %v376_v55 }
 0x18d   :  { %404 = vrot.lane.b32.xlu0 %v323_v36, %s707_s13 }
 0x195   :  { %512 = vrot.lane.b32.xlu0 %v504_v24, %s709_s1 }
 0x19d   :  { %518 = vrot.lane.b32.xlu0 %v507_v29, %s709_s1  ;;  %v89_v29 = vsel %vm85_vm9, %v814_v45, 0.0  ;;  %v640_v45 = vsel %vm423_vm1, 1.0, %v706_v7  ;;  %v98_v7 = vsel %vm17_vm14, %v90_v28, 0.0 }
 0x19e   :  { %v95_v33 = vsel %vm17_vm14, %v89_v29, 0.0  ;;  %v429_v6 = vadd.f32 1.0, %v640_v45  ;;  %vm113_vm14 = vmor %vm105_vm4, %vm109_vm3 }
 0x1a0   :  { %v431_v35 = vmax.f32 %v429_v6, 1.0 }
 0x1a2   :  { %v433_v36 = vmul.f32 2.0, %v431_v35 }
 0x1a4   :  { %677 = vrcp.f32 %v433_v36  ;;  %vm454_vm9 = vweird.f32 %v433_v36  ;;  %v460_v43 = vand.u32 2147483648, %v433_v36  ;;  %v458_v47 = vand.u32 2147483647, %v433_v36 }
 0x1a5   :  { %550 = vrot.lane.b32.xlu0 %v907_v0, %s710_s25 }
 0x1a6   :  { %vm459_vm15 = vcmp.eq.f32.partialorder %v458_v47, 8.507059e+37 }
 0x1aa   :  { %v678_v37 = vpop.eup %677 }
 0x1ab   :  { %v450_v38 = vmul.f32 %v678_v37, %v433_v36  ;;  %vm455_vm6 = vweird.f32 %v678_v37 }
 0x1ac   :  { %vm456_vm7 = vmor %vm454_vm9, %vm455_vm6 }
 0x1ad   :  { %382 = vrot.lane.b32.xlu0 %v302_v48, %s707_s13  ;;  %v451_v39 = vsub.f32 1.0, %v450_v38  ;;  %v461_v48 = vor.u32 1.1754944e-38, %v460_v43 }
 0x1af   :  { %v452_v42 = vmul.f32 %v678_v37, %v451_v39 }
 0x1b1   :  { %v453_v46 = vadd.f32 %v678_v37, %v452_v42 }
 0x1b3   :  { %v457_v49 = vsel %vm456_vm7, %v678_v37, %v453_v46 }
 0x1b4   :  { %v462_v50 = vsel %vm459_vm15, %v461_v48, %v457_v49 }
 0x1b5   :  { %v463_v52 = vmul.f32 0.1, %v462_v50 }
 0x1b9   :  { %v385_v57 = vpop.permute.xlu2 %384 }
 0x1ba   :  { %v395_v61 = vsel %vm105_vm4, %v377_v56, %v385_v57 }
 0x1bb   :  { %470 = vrot.lane.b32.xlu0 %v395_v61, %s707_s13 }
 0x1c1   :  { %v409_v0 = vpop.permute.xlu2 %408 }
 0x1c2   :  { %v417_v62 = vsel %vm111_vm5, %v377_v56, %v409_v0 }
 0x1c3   :  { %494 = vrot.lane.b32.xlu1 %v417_v62, %s707_s13 }
 0x1c9   :  { %v976_v3 = vpop.permute.xlu2 %516 }
 0x1ca   :  { %v978_v4 = vpop.permute.xlu1 %514 }
 0x1d1   :  { %v980_v8 = vpop.permute.xlu2 %548 }
 0x1d2   :  { %v982_v60 = vpop.permute.xlu1 %552 }
 0x1d9   :  { %v984_v9 = vpop.permute.xlu2 %554 }
 0x1e1   :  { %v403_v13 = vpop.permute.xlu2 %402 }
 0x1e2   :  { %v414_v17 = vsel %vm108_vm11, %v747_v18, %v403_v13 }
 0x1e4   :  { %v387_v10 = vpop.permute.xlu1 %386  ;;  %v998_v19 = vpop.xlane.xlu0 %93 }
 0x1e5   :  { %v396_v12 = vsel %vm106_vm10, %v747_v18, %v387_v10 }
 0x1e6   :  { %472 = vrot.lane.b32.xlu1 %v396_v12, %s707_s13 }
 0x1ec   :  { %v407_v15 = vpop.permute.xlu1 %406 }
 0x1ed   :  { %v416_v16 = vsel %vm110_vm13, %v747_v18, %v407_v15 }
 0x1ee   :  { %492 = vrot.lane.b32.xlu0 %v416_v16, %s707_s13  ;;  %488 = vrot.lane.b32.xlu1 %v414_v17, %s707_s13 }
 0x1f7   :  { %v389_v21 = vpop.permute.xlu0 %388 }
 0x1f8   :  { %v397_v22 = vsel %vm107_vm2, %v377_v56, %v389_v21 }
 0x1f9   :  { %474 = vrot.lane.b32.xlu2 %v397_v22, %s707_s13 }
 0x1ff   :  { %v405_v23 = vpop.permute.xlu0 %404 }
 0x200   :  { %v415_v24 = vsel %vm109_vm3, %v377_v56, %v405_v23 }
 0x201   :  { %490 = vrot.lane.b32.xlu2 %v415_v24, %s707_s13 }
 0x207   :  { %v1006_v25 = vpop.permute.xlu0 %512 }
 0x20f   :  { %v519_v27 = vpop.permute.xlu0 %518 }
 0x217   :  { %v551_v40 = vpop.permute.xlu0 %550 }
 0x218   :  { %102 = vadd.xlane.f32.xlu0 %v101_v31  ;;  %96 = vadd.xlane.f32.xlu1 %v95_v33 }
 0x21f   :  { %v383_v34 = vpop.permute.xlu0 %382 }
 0x220   :  { %v394_v44 = vsel %vm104_vm12, %v747_v18, %v383_v34 }
 0x221   :  { %468 = vrot.lane.b32.xlu2 %v394_v44, %s707_s13 }
 0x22d   :  { %v471_v53 = vpop.permute.xlu0 %470 }
 0x22e   :  { %v481_v0 = vsel %vm105_vm4, %v463_v52, %v471_v53  ;;  %vm584_vm4 = vcmask 23568  }
 0x22f   :  { %v525_v62 = vmul.f32 %v978_v4, %v481_v0 }
 0x235   :  { %v495_v54 = vpop.permute.xlu1 %494 }
 0x24a   :  { %99 = vadd.xlane.f32.xlu2 %v98_v7 }
 0x253   :  { %v475_v55 = vpop.permute.xlu2 %474 }
 0x254   :  { %v483_v56 = vsel %vm107_vm2, %v463_v52, %v475_v55 }
 0x255   :  { %v527_v57 = vmul.f32 %v519_v27, %v483_v56 }
 0x257   :  { %538 = vrot.lane.b32.xlu1 %v527_v57, %s711_s26 }
 0x258   :  { %v473_v41 = vpop.permute.xlu1 %472 }
 0x259   :  { %v482_v51 = vsel %vm106_vm10, %v747_v18, %v473_v41 }
 0x25a   :  { %v526_v61 = vmul.f32 %v976_v3, %v482_v51  ;;  %v503_v3 = vsel %vm111_vm5, %v463_v52, %v495_v54 }
 0x25b   :  { %v491_v12 = vpop.permute.xlu2 %490  ;;  %v563_v17 = vmul.f32 %v984_v9, %v503_v3 }
 0x25c   :  { %536 = vrot.lane.b32.xlu0 %v526_v61, %s711_s26  ;;  %v501_v15 = vsel %vm109_vm3, %v463_v52, %v491_v12  ;;  %vm115_vm3 = vmor %vm107_vm2, %vm111_vm5 }
 0x25d   :  { %v561_v16 = vmul.f32 %v551_v40, %v501_v15 }
 0x260   :  { %v489_v1 = vpop.permute.xlu1 %488  ;;  %v493_v22 = vpop.permute.xlu0 %492 }
 0x261   :  { %v500_v10 = vsel %vm108_vm11, %v747_v18, %v489_v1  ;;  %v502_v23 = vsel %vm110_vm13, %v747_v18, %v493_v22  ;;  %vm114_vm11 = vmor %vm106_vm10, %vm110_vm13 }
 0x262   :  { %v560_v13 = vmul.f32 %v980_v8, %v500_v10  ;;  %534 = vrot.lane.b32.xlu2 %v525_v62, %s711_s26  ;;  %v562_v24 = vmul.f32 %v982_v60, %v502_v23 }
 0x264   :  { %568 = vrot.lane.b32.xlu0 %v560_v13, %s711_s26 }
 0x26a   :  { %570 = vrot.lane.b32.xlu2 %v561_v16, %s711_s26 }
 0x26c   :  { %574 = vrot.lane.b32.xlu0 %v563_v17, %s711_s26 }
 0x27b   :  { %v469_v4 = vpop.permute.xlu2 %468 }
 0x27c   :  { %v480_v21 = vsel %vm104_vm12, %v747_v18, %v469_v4  ;;  %v116_v18 = vsub.f32 %v932_v20, %v998_v19 }
 0x27d   :  { %v524_v8 = vmul.f32 %v1006_v25, %v480_v21 }
 0x27f   :  { %532 = vrot.lane.b32.xlu1 %v524_v8, %s711_s26 }
 0x287   :  { %572 = vrot.lane.b32.xlu1 %v562_v24, %s711_s26 }
 0x28b   :  { %v103_v27 = vpop.xlane.xlu0 %102  ;;  %v97_v58 = vpop.xlane.xlu1 %96 }
 0x28c   :  { %v117_v33 = vsub.f32 %v903_v59, %v97_v58  ;;  %v119_v34 = vsub.f32 %v941_v26, %v103_v27  ;;  %v120_v59 = vsel %vm112_vm8, 0.0, %v116_v18 }
 0x28e   :  { %v121_v60 = vsel %vm113_vm14, 0.0, %v117_v33  ;;  %v123_v19 = vsel %vm115_vm3, 0.0, %v119_v34 }
 0x2bd   :  { %v100_v9 = vpop.xlane.xlu2 %99 }
 0x2be   :  { %v118_v20 = vsub.f32 %v912_v63, %v100_v9 }
 0x2c0   :  { %v122_v11 = vsel %vm114_vm11, 0.0, %v118_v20 }
 0x2c5   :  { %v535_v40 = vpop.permute.xlu2 %534 }
 0x2c6   :  { %v545_v2 = vadd.f32 %v535_v40, %v121_v60 }
 0x2c9   :  { %v539_v31 = vpop.permute.xlu1 %538 }
 0x2ca   :  { %v547_v6 = vadd.f32 %v539_v31, %v123_v19 }
 0x2cd   :  { %v571_v25 = vpop.permute.xlu2 %570 }
 0x2ce   :  { %v537_v29 = vpop.permute.xlu0 %536  ;;  %v581_v14 = vadd.f32 %v571_v25, %v545_v2 }
 0x2cf   :  { %v546_v38 = vadd.f32 %v537_v29, %v122_v11 }
 0x2d0   :  { %v586_v35 = vsel %vm584_vm4, %v581_v14, 0.0 }
 0x2d6   :  { %v569_v5 = vpop.permute.xlu0 %568 }
 0x2de   :  { %v575_v26 = vpop.permute.xlu0 %574 }
 0x2df   :  { %v583_v39 = vadd.f32 %v575_v26, %v547_v6 }
 0x2e1   :  { %v595_v46 = vsel %vm584_vm4, %v583_v39, 0.0 }
 0x2f1   :  { %v533_v44 = vpop.permute.xlu1 %532 }
 0x2f2   :  { %v544_v45 = vadd.f32 %v533_v44, %v120_v59 }
 0x2f4   :  { %v580_v32 = vadd.f32 %v569_v5, %v544_v45 }
 0x2f6   :  { %v585_v36 = vsel %vm584_vm4, %v580_v32, 0.0 }
 0x2f7   :  { %v587_v37 = vadd.f32 %v586_v35, %v585_v36 }
 0x2f9   :  { %v588_v42 = vrot.slane %v587_v37, 4  ;;  %v573_v63 = vpop.permute.xlu1 %572 }
 0x2fa   :  { %v582_v28 = vadd.f32 %v573_v63, %v546_v38 }
 0x2fb   :  { %v589_v43 = vadd.f32 %v588_v42, %v587_v37 }
 0x2fc   :  { %v594_v30 = vsel %vm584_vm4, %v582_v28, 0.0 }
 0x2fd   :  { %v596_v47 = vadd.f32 %v595_v46, %v594_v30  ;;  %v590_v7 = vrot.slane %v589_v43, 2 }
 0x2ff   :  { %v597_v48 = vrot.slane %v596_v47, 4  ;;  %v591_v49 = vadd.f32 %v590_v7, %v589_v43 }
 0x301   :  { %v598_v50 = vadd.f32 %v597_v48, %v596_v47  ;;  %v592_v54 = vrot.slane %v591_v49, 1 }
 0x303   :  { %v599_v52 = vrot.slane %v598_v50, 2  ;;  %v593_v55 = vadd.f32 %v592_v54, %v591_v49 }
 0x305   :  { %605 = vperm.xlu2 %652, %v593_v55   ;;  %v600_v56 = vadd.f32 %v599_v52, %v598_v50 }
 0x307   :  { %v601_v57 = vrot.slane %v600_v56, 1 }
 0x309   :  { %v602_v41 = vadd.f32 %v601_v57, %v600_v56 }
 0x30b   :  { %610 = vperm.xlu1 %651, %v602_v41  }
 0x35f   :  { %v606_v51 = vpop.permute.xlu2 %605 }
 0x360   :  { %613 = vst [vmem:[#allocation2] sm:$0x1] %v606_v51 }
 0x37d   :  { %v611_v53 = vpop.permute.xlu1 %610 }
 0x37e   :  { %614 = vst [vmem:[#allocation2 + $0x1] sm:$0x1] %v611_v53 }
 0x37f   :  { %627 = dma.vmem_to_hbm [thread:$0]  %s620_s28, 32, %s622_s3, [#allocation3], %s713_s4, %s713_s4, %s707_s13  }
 0x380   :  { %703 = dma.done.wait [#allocation3], 32  }
 0x381   :  { %704 = vsyncadd [#allocation3], 4294967264 }
 0x382   :  { %632 = vsyncpa [#allocation3], 1 }

</bundles_post_ra>
